<compile_context>
chip_gen: v7x
topology: tpu7x:2x2x1
jax: 0.10.0
libtpu: 0.0.40
codegen_flags: <defaults>
</compile_context>

<pallas_src>
import functools

import jax
import jax.numpy as jnp
from jax.experimental import pallas as pl
from jax.experimental.pallas import tpu as pltpu

HIDDEN = 128  # fixed by the PyTorch module


def _round_up(x, m):
    return (x + m - 1) // m * m


# ----------------------------------------------------------------------------
# Parameter packing.
#   Weights -> one contiguous, 8-row-aligned, 128-lane bf16 buffer:
#     rows [0, in_pad)            : w1  (rows >= In, cols >= H are zero)
#     rows [in_pad, in_pad+n_pad) : w2  (rows >= H,  cols >= Out are zero)
#   Biases  -> one tiny (8, n_pad) f32 buffer (row 0 = b1, row 1 = b2), kept
#   in f32 to avoid quantizing the biases of the original f32 module.
# ----------------------------------------------------------------------------
def pack_qnet_params(w1, b1, w2, b2, *, dtype=jnp.bfloat16):
    in_size, hidden = w1.shape
    out_size = w2.shape[1]
    in_pad = _round_up(max(in_size, 8), 8)
    n_pad = _round_up(max(hidden, out_size, 128), 128)

    w = jnp.zeros((in_pad + n_pad, n_pad), jnp.float32)
    w = w.at[:in_size, :hidden].set(w1)
    w = w.at[in_pad:in_pad + hidden, :out_size].set(w2)

    b = jnp.zeros((8, n_pad), jnp.float32)
    b = b.at[0, :hidden].set(b1)
    b = b.at[1, :out_size].set(b2)

    meta = (in_size, hidden, out_size, in_pad, n_pad)
    return w.astype(dtype), b, meta


# ----------------------------------------------------------------------------
# Kernel: one batch tile per grid step; weights/biases stay VMEM-resident
# (constant index_map). bf16 MXU matmuls with f32 accumulation; bias + ReLU
# in f32 on the VPU; lane-dense bf16 output slab (unmasked vst).
# ----------------------------------------------------------------------------
def qnet_kernel(x_ref, w_ref, b_ref, o_ref, *, in_pad, n_pad):
    x = x_ref[...]                            # (TB, in_pad) bf16
    w1 = w_ref[0:in_pad, :]                   # (in_pad, n_pad) bf16
    w2 = w_ref[in_pad:in_pad + n_pad, :]      # (n_pad, n_pad) bf16
    b1 = b_ref[0:1, :]                        # (1, n_pad) f32
    b2 = b_ref[1:2, :]                        # (1, n_pad) f32

    # Layer 1: bf16 MXU matmul, f32 accumulation; bias + ReLU in f32.
    h = jnp.dot(x, w1, preferred_element_type=jnp.float32)
    h = jnp.maximum(h + b1, 0.0)

    # Layer 2 (padded output columns get exactly zero weight + zero bias).
    y = jnp.dot(h.astype(jnp.bfloat16), w2, preferred_element_type=jnp.float32)
    o_ref[...] = (y + b2).astype(o_ref.dtype)  # (TB, n_pad) bf16 slab


# ----------------------------------------------------------------------------
# Wrapper: pads+casts x to bf16 in one op, tiles the batch, slices the real
# output. tile_b=1024 keeps the per-step overhead amortized on a mem-bound
# kernel (same choice for v5e/v6e/v7x).
# ----------------------------------------------------------------------------
def qnet_forward(x, packed_w, biases_f32, meta, *, tile_b=1024):
    in_size, hidden, out_size, in_pad, n_pad = meta
    batch = x.shape[0]

    if batch <= 8:
        tb = 8                                   # single step: latency floor,
        b_pad = 8                                # nothing tiling can win here
    elif batch <= tile_b:
        # >=2 grid steps so v7x's second TensorCore participates.
        tb = _round_up(-(-batch // 2), 8)
        b_pad = 2 * tb
    else:
        tb = _round_up(tile_b, 8)
        b_pad = _round_up(batch, tb)

    # Single pad+cast pass over x (bf16): extra rows/cols are zero and inert.
    x_p = jnp.zeros((b_pad, in_pad), jnp.bfloat16)
    x_p = x_p.at[:batch, :in_size].set(x.astype(jnp.bfloat16))

    kernel = functools.partial(qnet_kernel, in_pad=in_pad, n_pad=n_pad)
    flops = 2 * batch * (in_size * hidden + hidden * out_size)
    bytes_accessed = (x_p.size * 2 + packed_w.size * 2
                      + biases_f32.size * 4 + b_pad * n_pad * 2)

    out_pad = pl.pallas_call(
        kernel,
        out_shape=jax.ShapeDtypeStruct((b_pad, n_pad), jnp.bfloat16),
        grid=(b_pad // tb,),
        in_specs=[
            pl.BlockSpec((tb, in_pad), lambda i: (i, 0)),        # batch tile
            pl.BlockSpec(packed_w.shape, lambda i: (0, 0)),      # resident
            pl.BlockSpec(biases_f32.shape, lambda i: (0, 0)),    # resident
        ],
        out_specs=pl.BlockSpec((tb, n_pad), lambda i: (i, 0)),   # lane-dense
        compiler_params=pltpu.CompilerParams(
            dimension_semantics=("parallel",),   # batch shards across v7x TCs
        ),
        cost_estimate=pl.CostEstimate(
            flops=flops, transcendentals=0, bytes_accessed=bytes_accessed),
    )(x_p, packed_w, biases_f32)

    # Padded rows/lanes hold inert garbage (ReLU(b1)·w2+b2); slice them away.
    return out_pad[:batch, :out_size].astype(jnp.float32)


# ----------------------------------------------------------------------------
# Init + reference (reference mirrors the kernel's bf16-weight / f32-acc /
# f32-bias math).
# ----------------------------------------------------------------------------
def init_qnet_params(key, input_size, output_size, hidden=HIDDEN):
    k1, k2, k3, k4 = jax.random.split(key, 4)
    bound1 = 1.0 / jnp.sqrt(input_size)
    bound2 = 1.0 / jnp.sqrt(hidden)
    w1 = jax.random.uniform(k1, (input_size, hidden), jnp.float32, -bound1, bound1)
    b1 = jax.random.uniform(k2, (hidden,), jnp.float32, -bound1, bound1)
    w2 = jax.random.uniform(k3, (hidden, output_size), jnp.float32, -bound2, bound2)
    b2 = jax.random.uniform(k4, (output_size,), jnp.float32, -bound2, bound2)
    return w1, b1, w2, b2


def qnet_reference(x, w1, b1, w2, b2):
    bf = jnp.bfloat16
    h = jnp.dot(x.astype(bf), w1.astype(bf), preferred_element_type=jnp.float32)
    h = jnp.maximum(h + b1, 0.0)
    y = jnp.dot(h.astype(bf), w2.astype(bf), preferred_element_type=jnp.float32)
    return (y + b2).astype(bf).astype(jnp.float32)


if __name__ == "__main__":
    key = jax.random.PRNGKey(0)
    kx, kx2, kp = jax.random.split(key, 3)

    input_size = 32     # e.g. encoded MasterMind state
    output_size = 16    # e.g. number of candidate guesses / actions

    w1, b1, w2, b2 = init_qnet_params(kp, input_size, output_size)
    packed_w, biases_f32, meta = pack_qnet_params(w1, b1, w2, b2)

    # Case 1: tiny inference batch (single grid step).
    x = jax.random.normal(kx, (8, input_size), jnp.float32)
    out = jax.block_until_ready(qnet_forward(x, packed_w, biases_f32, meta))
    ref = qnet_reference(x, w1, b1, w2, b2)
    assert out.shape == (8, output_size)
    assert jnp.allclose(out, ref, atol=1e-2, rtol=1e-2), "mismatch (batch=8)"

    # Case 2: mid-size batch -> two grid steps (v7x megacore path).
    x2 = jax.random.normal(kx2, (40, input_size), jnp.float32)
    out2 = jax.block_until_ready(qnet_forward(x2, packed_w, biases_f32, meta))
    ref2 = qnet_reference(x2, w1, b1, w2, b2)
    assert out2.shape == (40, output_size)
    assert jnp.allclose(out2, ref2, atol=1e-2, rtol=1e-2), "mismatch (batch=40)"

    print("KERNEL_OK")
</pallas_src>

<mosaic_0001>
module attributes {stable_mosaic.version = 11 : i64} {
  func.func @qnet_kernel(%arg0: i32, %arg1: memref<8x32xbf16, #tpu.memory_space<vmem>>, %arg2: memref<160x128xbf16, #tpu.memory_space<vmem>>, %arg3: memref<8x128xf32, #tpu.memory_space<vmem>>, %arg4: memref<8x128xbf16, #tpu.memory_space<vmem>>) attributes {dimension_semantics = [#tpu.dimension_semantics<parallel>], iteration_bounds = array<i64: 1>, scalar_prefetch = 0 : i64, scratch_operands = 0 : i64, tpu.core_type = #tpu.core_type<tc>, window_params = [{transform_indices = @transform_0, window_bounds = array<i64: 8, 32>}, {pipeline_mode = #tpu.pipeline_mode<synchronous>, transform_indices = @transform_1, window_bounds = array<i64: 160, 128>}, {pipeline_mode = #tpu.pipeline_mode<synchronous>, transform_indices = @transform_2, window_bounds = array<i64: 8, 128>}, {transform_indices = @transform_3, window_bounds = array<i64: 8, 128>}]} {
    %c0 = arith.constant 0 : index
    %c0_0 = arith.constant 0 : index
    %0 = vector.load %arg1[%c0, %c0_0] : memref<8x32xbf16, #tpu.memory_space<vmem>>, vector<8x32xbf16>
    %c0_1 = arith.constant 0 : index
    %c0_2 = arith.constant 0 : index
    %1 = vector.load %arg2[%c0_1, %c0_2] : memref<160x128xbf16, #tpu.memory_space<vmem>>, vector<32x128xbf16>
    %c32 = arith.constant 32 : index
    %c0_3 = arith.constant 0 : index
    %2 = vector.load %arg2[%c32, %c0_3] : memref<160x128xbf16, #tpu.memory_space<vmem>>, vector<128x128xbf16>
    %c0_4 = arith.constant 0 : index
    %c0_5 = arith.constant 0 : index
    %3 = vector.load %arg3[%c0_4, %c0_5] : memref<8x128xf32, #tpu.memory_space<vmem>>, vector<1x128xf32>
    %c1 = arith.constant 1 : index
    %c0_6 = arith.constant 0 : index
    %4 = vector.load %arg3[%c1, %c0_6] : memref<8x128xf32, #tpu.memory_space<vmem>>, vector<1x128xf32>
    %cst = arith.constant dense<0.000000e+00> : vector<8x128xf32>
    %5 = tpu.matmul %0, %1, %cst {dimension_numbers = #tpu.dot_dimension_numbers<[1], [0], [0], [1], [0, 0, 1, 1], [], []>} : vector<8x32xbf16>, vector<32x128xbf16>, vector<8x128xf32> -> vector<8x128xf32>
    %6 = vector.broadcast %3 : vector<1x128xf32> to vector<8x128xf32>
    %7 = arith.addf %5, %6 : vector<8x128xf32>
    %cst_7 = arith.constant 0.000000e+00 : f32
    %8 = vector.broadcast %cst_7 : f32 to vector<8x128xf32>
    %9 = arith.maximumf %7, %8 : vector<8x128xf32>
    %10 = arith.truncf %9 : vector<8x128xf32> to vector<8x128xbf16>
    %cst_8 = arith.constant dense<0.000000e+00> : vector<8x128xf32>
    %11 = tpu.matmul %10, %2, %cst_8 {dimension_numbers = #tpu.dot_dimension_numbers<[1], [0], [0], [1], [0, 0, 1, 1], [], []>} : vector<8x128xbf16>, vector<128x128xbf16>, vector<8x128xf32> -> vector<8x128xf32>
    %12 = vector.broadcast %4 : vector<1x128xf32> to vector<8x128xf32>
    %13 = arith.addf %11, %12 : vector<8x128xf32>
    %14 = arith.truncf %13 : vector<8x128xf32> to vector<8x128xbf16>
    %c0_9 = arith.constant 0 : index
    %c0_10 = arith.constant 0 : index
    %15 = vector.load %arg4[%c0_9, %c0_10] : memref<8x128xbf16, #tpu.memory_space<vmem>>, vector<8x128xbf16>
    tpu.vector_store %arg4[%c0_9, %c0_10], %14 {strides = array<i32>} : memref<8x128xbf16, #tpu.memory_space<vmem>>, vector<8x128xbf16>,
    return
  }
  func.func @transform_0(%arg0: i32) -> (i32, i32) {
    %c0_i32 = arith.constant 0 : i32
    %c0_i32_0 = arith.constant 0 : i32
    return %arg0, %c0_i32 : i32, i32
  }
  func.func @transform_1(%arg0: i32) -> (i32, i32) {
    %c0_i32 = arith.constant 0 : i32
    %c0_i32_0 = arith.constant 0 : i32
    %c0_i32_1 = arith.constant 0 : i32
    return %c0_i32, %c0_i32_0 : i32, i32
  }
  func.func @transform_2(%arg0: i32) -> (i32, i32) {
    %c0_i32 = arith.constant 0 : i32
    %c0_i32_0 = arith.constant 0 : i32
    %c0_i32_1 = arith.constant 0 : i32
    return %c0_i32, %c0_i32_0 : i32, i32
  }
  func.func @transform_3(%arg0: i32) -> (i32, i32) {
    %c0_i32 = arith.constant 0 : i32
    %c0_i32_0 = arith.constant 0 : i32
    return %arg0, %c0_i32 : i32, i32
  }
}

</mosaic_0001>

<bundles_post_ra>
// kernel: tpu_custom_call.1
= control target key start
LH: loop header
LB: loop body
LE: loop exit
PB: predicated region body
PF: predicated region fallthrough
CT: control target
= control target key end

     0   :  { %8 = vsyncpa [#allocation3], 0  ;;  %s489_s0 = inlined_call_operand.hbm [shape: bf16[8,32], index: 0, kind: input, shape index: {}]   ;;  %s490_s1 = inlined_call_operand.hbm [shape: bf16[160,128], index: 1, kind: input, shape index: {}]   ;;  %s491_s2 = inlined_call_operand.hbm [shape: f32[8,128], index: 2, kind: input, shape index: {}]   ;;  %s492_s3 = inlined_call_operand.hbm [shape: bf16[8,128], index: 3, kind: output, shape index: {}]  }
   0x1   :  { %9 = vsyncpa [#allocation6], 0 }
   0x2   :  { %10 = vsyncpa [#allocation4], 0  ;;  %s413_s12 = smov [#allocation5]   ;;  %s319_s16 = scalar_lea.hbm %s490_s1, 1280 }
   0x3   :  { %s26_s13 = sshll.u32 %s413_s12, 4  ;;  %p320_p0 = scmp.ne.s32.totalorder %s490_s1, %s319_s16  ;;  %s27_s13 = int_to_ptr.vmem [resolvable:$true] %s26_s13 }
   0x4   :  { %p323_p1 = scmp.lt.u32.totalorder %s319_s16, %s490_s1 }
   0x6   :  { %p325_p2 = pnand %p323_p1, %p320_p0 }
   0x8   :  { %328 = shalt.err (!%p325_p2)
}
   0x9   :  { %s329_s21 = scalar_lea.vmem %s27_s13, 1280  ;;  %p334_p4 = scmp.lt.s32.totalorder %s27_s13, %s27_s13 }
   0xa   :  { %p330_p3 = scmp.ne.s32.totalorder %s27_s13, %s329_s21  ;;  %p335_p5 = scmp.lt.s32.totalorder %s329_s21, %s329_s21 }
   0xc   :  { %p336_p6 = por %p335_p5, %p334_p4 }
   0xe   :  { %p337_p7 = pnand %p336_p6, %p330_p3 }
  0x10   :  { %340 = shalt.err (!%p337_p7)
}
  0x11   :  { %s414_s22 = smov 64   ;;  %s415_s23 = smov 4  }
  0x12   :  { %32 = dma.hbm_to_vmem [thread:$0]  %s490_s1, 1280, %s27_s13, [#allocation6], %s414_s22, %s414_s22, %s415_s23  }
  0x13   :  { %s416_s26 = smov [#allocation2]   ;;  %s417_s28 = smov [#allocation7]  }
  0x14   :  { %s17_s27 = sshll.u32 %s416_s26, 4  ;;  %s39_s29 = sshll.u32 %s417_s28, 4  ;;  %s18_s27 = int_to_ptr.vmem [resolvable:$true] %s17_s27  ;;  %s40_s29 = int_to_ptr.vmem [resolvable:$true] %s39_s29 }
  0x15   :  { %s341_s5 = scalar_lea.hbm %s489_s0, 64 }
  0x16   :  { %p342_p8 = scmp.ne.s32.totalorder %s489_s0, %s341_s5  ;;  %p345_p9 = scmp.lt.u32.totalorder %s341_s5, %s489_s0 }
  0x18   :  { %p347_p10 = pnand %p345_p9, %p342_p8 }
  0x1a   :  { %350 = shalt.err (!%p347_p10)
}
  0x1b   :  { %s351_s1 = scalar_lea.vmem %s18_s27, 64  ;;  %p356_p12 = scmp.lt.s32.totalorder %s18_s27, %s18_s27 }
  0x1c   :  { %p352_p11 = scmp.ne.s32.totalorder %s18_s27, %s351_s1  ;;  %p357_p13 = scmp.lt.s32.totalorder %s351_s1, %s351_s1 }
  0x1e   :  { %p358_p0 = por %p357_p13, %p356_p12 }
  0x20   :  { %p359_p1 = pnand %p358_p0, %p352_p11 }
  0x22   :  { %362 = shalt.err (!%p359_p1)
}
  0x23   :  { %20 = dma.hbm_to_vmem [thread:$0]  %s489_s0, 64, %s18_s27, [#allocation3]  }
  0x24   :  { %s363_s14 = scalar_lea.hbm %s491_s2, 128 }
  0x25   :  { %p364_p2 = scmp.ne.s32.totalorder %s491_s2, %s363_s14  ;;  %p367_p3 = scmp.lt.u32.totalorder %s363_s14, %s491_s2 }
  0x27   :  { %p369_p4 = pnand %p367_p3, %p364_p2 }
  0x29   :  { %372 = shalt.err (!%p369_p4)
}
  0x2a   :  { %s373_s19 = scalar_lea.vmem %s40_s29, 128  ;;  %p378_p6 = scmp.lt.s32.totalorder %s40_s29, %s40_s29 }
  0x2b   :  { %p374_p5 = scmp.ne.s32.totalorder %s40_s29, %s373_s19  ;;  %p379_p7 = scmp.lt.s32.totalorder %s373_s19, %s373_s19 }
  0x2d   :  { %p380_p8 = por %p379_p7, %p378_p6 }
  0x2f   :  { %p381_p9 = pnand %p380_p8, %p374_p5 }
  0x31   :  { %384 = shalt.err (!%p381_p9)
}
  0x32   :  { %42 = dma.hbm_to_vmem [thread:$0]  %s491_s2, 128, %s40_s29, [#allocation6]  }
  0x33   :  { %407 = dma.done.wait [#allocation3], 64  }
  0x34   :  { %408 = vsyncadd [#allocation3], 4294967232 }
  0x35   :  { %409 = dma.done.wait [#allocation6], 1408  }
  0x36   :  { %410 = vsyncadd [#allocation6], 4294965888  ;;  %v418_v0 = vmov 0.0   ;;  %vm419_vm0 = vmmov 0   ;;  %v309_v1 = vld [vmem:[#allocation5] sm:$0xff]   ;;  %v310_v2 = vld [vmem:[#allocation5 + $0x8] sm:$0xff]  }
  0x37   :  { %273 = vmatprep.subr.bf16.mxu0 %v418_v0  ;;  %277 = vmatprep.mubr.msk.bf16.mxu0 %vm419_vm0, %v418_v0  ;;  %v311_v3 = vld [vmem:[#allocation5 + $0x10] sm:$0xff]   ;;  %vm92_vm1 = vcmask 261120   ;;  %v312_v4 = vld [vmem:[#allocation5 + $0x18] sm:$0xff]   ;;  %v313_v6 = vld [vmem:[#allocation5 + $0x20] sm:$0xff]   ;;  %s420_s2 = smov [#allocation8]  }
  0x38   :  { %281 = vmatprep.subr.bf16.mxu1 %v418_v0  ;;  %297 = vmatprep.mubr.msk.bf16.mxu1 %vm419_vm0, %v418_v0  ;;  %v53_v5 = vld [vmem:[#allocation2] sm:$0xf]  ;;  %v314_v7 = vld [vmem:[#allocation5 + $0x28] sm:$0xff]   ;;  %v315_v8 = vld [vmem:[#allocation5 + $0x30] sm:$0xff]   ;;  %s238_s21 = sshll.u32 %s420_s2, 4  ;;  %s239_s21 = int_to_ptr.vmem [resolvable:$true] %s238_s21 }
  0x39   :  { %274 = vmatpush3.bf16.msra.mxu0 %v309_v1  ;;  %282 = vmatpush3.bf16.msra.mxu1 %v311_v3  ;;  %v316_v9 = vld [vmem:[#allocation5 + $0x38] sm:$0xff]   ;;  %v317_v10 = vld [vmem:[#allocation5 + $0x40] sm:$0xff]   ;;  %v318_v11 = vld [vmem:[#allocation5 + $0x48] sm:$0xff]   ;;  %s385_s22 = scalar_lea.vmem %s239_s21, 64  ;;  %p390_p11 = scmp.lt.s32.totalorder %s239_s21, %s239_s21 }
  0x3a   :  { %275 = vmatprep.subr.bf16.mxu0 %v418_v0  ;;  %283 = vmatprep.subr.bf16.mxu1 %v418_v0  ;;  %v248_v12 = vld [vmem:[#allocation7] ss:$0 sm:$0xff]  ;;  %v252_v20 = vld [vmem:[#allocation7 + $0x1] ss:$0 sm:$0xff]  ;;  %p386_p10 = scmp.ne.s32.totalorder %s239_s21, %s385_s22  ;;  %p391_p12 = scmp.lt.s32.totalorder %s385_s22, %s385_s22 }
  0x3c   :  { %p392_p13 = por %p391_p12, %p390_p11 }
  0x3d   :  { %276 = vmatpush3.bf16.msra.mxu0 %v310_v2  ;;  %284 = vmatpush3.bf16.msra.mxu1 %v312_v4 }
  0x3e   :  { %285 = vmatprep.subr.bf16.mxu1 %v418_v0  ;;  %p393_p0 = pnand %p392_p13, %p386_p10 }
  0x40   :  { %278 = vmatmul.mubr.msk.bf16.vlgmr.msra.gmra.mrb[0].mxu0 %vm92_vm1, %v53_v5 }
  0x41   :  { %286 = vmatpush3.bf16.msra.mxu1 %v313_v6 }
  0x42   :  { %287 = vmatprep.subr.bf16.mxu1 %v418_v0 }
  0x45   :  { %288 = vmatpush3.bf16.msra.mxu1 %v314_v7 }
  0x46   :  { %289 = vmatprep.subr.bf16.mxu1 %v418_v0 }
  0x49   :  { %290 = vmatpush3.bf16.msra.mxu1 %v315_v8 }
  0x4a   :  { %291 = vmatprep.subr.bf16.mxu1 %v418_v0 }
  0x4d   :  { %292 = vmatpush3.bf16.msra.mxu1 %v316_v9 }
  0x4e   :  { %293 = vmatprep.subr.bf16.mxu1 %v418_v0 }
  0x51   :  { %294 = vmatpush3.bf16.msra.mxu1 %v317_v10 }
  0x52   :  { %295 = vmatprep.subr.bf16.mxu1 %v418_v0 }
  0x55   :  { %296 = vmatpush3.bf16.msra.mxu1 %v318_v11 }
 0x113   :  { %v130_v13 = vpop.f32.mrb[0].mxu0 }
 0x114   :  { %v131_v14 = vadd.f32 %v248_v12, %v130_v13  ;;  %v279_v15 = vpop.f32.mrb[1].mxu0 }
 0x115   :  { %v133_v16 = vpop.f32.mrb[2].mxu0 }
 0x116   :  { %v136_v17 = vmax.f32 %v131_v14, 0.0  ;;  %v280_v18 = vpop.f32.mrb[3].mxu0 }
 0x118   :  { %v137_v19 = vpack.c.bf16 %v136_v17, %v136_v17 }
 0x11a   :  { %298 = vmatmul.mubr.bf16.vlgmr.msra.gmra.mrb[0].mxu1 %v137_v19 }
 0x1ed   :  { %v224_v21 = vpop.f32.mrb[0].mxu1 }
 0x1ee   :  { %v225_v22 = vadd.f32 %v252_v20, %v224_v21  ;;  %v299_v23 = vpop.f32.mrb[1].mxu1 }
 0x1ef   :  { %v227_v24 = vpop.f32.mrb[2].mxu1 }
 0x1f0   :  { %v230_v25 = vpack.c.bf16 %v225_v22, %v225_v22  ;;  %v300_v26 = vpop.f32.mrb[3].mxu1 }
 0x1f2   :  { %231 = vst [vmem:[#allocation8] sm:$0xf] %v230_v25 }
 0x1f3   :  { %396 = shalt.err (!%p393_p0)
}
 0x1f4   :  { %s397_s25 = scalar_lea.hbm %s492_s3, 64 }
 0x1f5   :  { %p398_p1 = scmp.ne.s32.totalorder %s492_s3, %s397_s25  ;;  %p401_p2 = scmp.lt.u32.totalorder %s397_s25, %s492_s3 }
 0x1f7   :  { %p403_p3 = pnand %p401_p2, %p398_p1 }
 0x1f9   :  { %406 = shalt.err (!%p403_p3)
}
 0x1fa   :  { %241 = dma.vmem_to_hbm [thread:$0]  %s239_s21, 64, %s492_s3, [#allocation4]  }
 0x1fb   :  { %411 = dma.done.wait [#allocation4], 64  }
 0x1fc   :  { %412 = vsyncadd [#allocation4], 4294967232 }
 0x1fd   :  { %245 = vsyncpa [#allocation3], 1 }
 0x1fe   :  { %246 = vsyncpa [#allocation6], 1 }
 0x1ff   :  { %247 = vsyncpa [#allocation4], 1 }

</bundles_post_ra>
